<compile_context>
chip_gen: v5e
topology: v5e:2x2
jax: 0.10.0
libtpu: 0.0.40
codegen_flags: <defaults>
</compile_context>

<pallas_src>
import math
import jax
import jax.numpy as jnp
from jax.experimental import pallas as pl
from jax.experimental.pallas import tpu as pltpu


_INV_SQRT2 = 1.0 / math.sqrt(2.0)


def _round_up(a, b):
    return (a + b - 1) // b * b


def _gelu_exact_f32(h):
    # Exact GELU (erf form), computed in f32.
    return 0.5 * h * (1.0 + jax.lax.erf(h * jnp.float32(_INV_SQRT2)))


# --------------------------------------------------------------------------- #
# Kernels
# --------------------------------------------------------------------------- #
def _mlp_kernel_resident(x_ref, w1_ref, b1_ref, w2_ref, b2_ref, o_ref):
    # Weights fully VMEM-resident (constant block index): no accumulator needed.
    h = jnp.dot(x_ref[...], w1_ref[...], preferred_element_type=jnp.float32)
    h = _gelu_exact_f32(h + b1_ref[...])
    out = jnp.dot(h.astype(w2_ref.dtype), w2_ref[...],
                  preferred_element_type=jnp.float32)
    o_ref[...] = (out + b2_ref[...]).astype(o_ref.dtype)


def _mlp_kernel_streamed(x_ref, w1_ref, b1_ref, w2_ref, b2_ref, o_ref, acc_ref):
    # Hidden dimension tiled over grid axis 1; f32 accumulator in VMEM scratch.
    k = pl.program_id(1)

    @pl.when(k == 0)
    def _():
        acc_ref[...] = jnp.zeros_like(acc_ref)

    h = jnp.dot(x_ref[...], w1_ref[...], preferred_element_type=jnp.float32)
    h = _gelu_exact_f32(h + b1_ref[...])
    acc_ref[...] += jnp.dot(h.astype(w2_ref.dtype), w2_ref[...],
                            preferred_element_type=jnp.float32)

    @pl.when(k == pl.num_programs(1) - 1)
    def _():
        o_ref[...] = (acc_ref[...] + b2_ref[...]).astype(o_ref.dtype)


# --------------------------------------------------------------------------- #
# Host-side tiling heuristics
# --------------------------------------------------------------------------- #
def _hw_params():
    """Returns (usable_vmem_bytes, tm_target, tn_target) for the local TPU."""
    vmem_cap = 64 << 20
    try:
        info = pltpu.get_tpu_info()
        vmem_cap = int(getattr(info, "vmem_capacity_bytes", vmem_cap))
    except Exception:
        pass
    # Leave headroom for compiler-internal scratch / semaphores.
    usable = min(max(vmem_cap - (8 << 20), 24 << 20), 100 << 20)
    # Arithmetic intensity knob: FLOP per weight byte ~= tm, must clear the
    # compute/HBM ridge (~240 v5e, ~650 v6e, ~310 v7x).
    if vmem_cap >= (96 << 20):      # v5e / v6e (128 MiB physical VMEM)
        tm_target, tn_target = 1024, 1024
    else:                           # v7x (64 MiB physical VMEM)
        tm_target, tn_target = 512, 512
    return usable, tm_target, tn_target


def _footprint(tm, tn, n_embd, hidden, esz, osz, resident):
    w_dim = hidden if resident else tn
    f = (2 * tm * n_embd * esz          # x tile (double-buffered)
         + 2 * n_embd * w_dim * esz     # W1 block
         + 2 * w_dim * 4                # b1 (f32)
         + 2 * w_dim * n_embd * esz     # W2 block
         + 2 * n_embd * 4               # b2 (f32)
         + 2 * tm * n_embd * osz)       # out tile
    if not resident:
        f += tm * n_embd * 4            # f32 accumulator scratch
    return f


def _pick_tn(hidden, tn_target):
    """Largest lane-aligned divisor of `hidden` that is <= tn_target
    (preferring multiples of 256 for the 256-wide MXU on v6e/v7x)."""
    if hidden <= tn_target:
        return hidden
    for step in (256, 128):
        t = (tn_target // step) * step
        while t >= step:
            if hidden % t == 0:
                return t
            t -= step
    return hidden


# --------------------------------------------------------------------------- #
# Wrapper
# --------------------------------------------------------------------------- #
def mlp_pallas(x, w1, b1, w2, b2, *, tm=None, tn=None,
               compute_dtype=jnp.bfloat16, out_dtype=None):
    """x: (M, n_embd); w1: (n_embd, hidden); b1: (hidden,);
    w2: (hidden, n_embd); b2: (n_embd,). Returns (M, n_embd)."""
    M, n_embd = x.shape
    hidden = w1.shape[1]
    out_dtype = x.dtype if out_dtype is None else jnp.dtype(out_dtype)

    usable_vmem, tm_target, tn_target = _hw_params()
    if tm is not None:
        tm_target = tm
    if tn is not None:
        tn_target = tn

    cdt = jnp.dtype(compute_dtype)
    esz = cdt.itemsize
    osz = jnp.dtype(out_dtype).itemsize

    # ---- row tiling: multiple of 16 (bf16 sublane packing) ------------------
    tm_eff = min(tm_target, _round_up(M, 16))
    # Megacore (v7x has 2 TCs sharded over the "parallel" axis): prefer >= 2
    # row blocks when halving the tile still keeps AI well above the ridge.
    if _round_up(M, tm_eff) // tm_eff == 1 and tm_eff >= 512:
        tm_eff = _round_up(-(-M // 2), 16)

    # ---- resident vs streamed weights ---------------------------------------
    def fits(tm_, tn_, resident_):
        return _footprint(tm_, tn_, n_embd, hidden, esz, osz, resident_) <= usable_vmem

    resident = fits(tm_eff, hidden, True)
    if resident:
        tn_eff = hidden
    else:
        tn_eff = _pick_tn(hidden, tn_target)
        # Shrink tn (then tm) until the double-buffered blocks fit the budget.
        while not fits(tm_eff, tn_eff, False) and tn_eff > 128:
            new_tn = _pick_tn(hidden, max(128, tn_eff // 2))
            if new_tn >= tn_eff:
                break
            tn_eff = new_tn
        while not fits(tm_eff, tn_eff, False) and tm_eff > 16:
            tm_eff = max(16, _round_up(tm_eff // 2, 16))

    M_pad = _round_up(M, tm_eff)
    if M_pad != M:
        x = jnp.pad(x, ((0, M_pad - M), (0, 0)))

    # ---- dtype handling: cast only if needed (persist bf16 weights upstream) -
    x_c = x if x.dtype == cdt else x.astype(cdt)
    w1_c = w1 if w1.dtype == cdt else w1.astype(cdt)
    w2_c = w2 if w2.dtype == cdt else w2.astype(cdt)
    b1_2d = b1.reshape(1, hidden).astype(jnp.float32)
    b2_2d = b2.reshape(1, n_embd).astype(jnp.float32)

    n_i = M_pad // tm_eff
    n_k = 1 if resident else hidden // tn_eff

    # ---- cost hint: weight bytes re-streamed once per row block (if streamed)
    weight_passes = 1 if resident else n_i
    cost = pl.CostEstimate(
        flops=4 * M_pad * n_embd * hidden,
        transcendentals=M_pad * hidden,
        bytes_accessed=(M_pad * n_embd * esz
                        + weight_passes * 2 * n_embd * hidden * esz
                        + hidden * 4 + n_embd * 4
                        + M_pad * n_embd * osz))

    footprint = _footprint(tm_eff, tn_eff, n_embd, hidden, esz, osz, resident)
    vmem_limit = int(min(max(footprint * 5 // 4 + (2 << 20), 16 << 20), usable_vmem))

    if resident:
        grid_spec = pltpu.PrefetchScalarGridSpec(
            num_scalar_prefetch=0,
            grid=(n_i,),
            in_specs=[
                pl.BlockSpec((tm_eff, n_embd), lambda i: (i, 0)),   # x tile
                pl.BlockSpec((n_embd, hidden), lambda i: (0, 0)),   # W1 (resident)
                pl.BlockSpec((1, hidden),      lambda i: (0, 0)),   # b1
                pl.BlockSpec((hidden, n_embd), lambda i: (0, 0)),   # W2 (resident)
                pl.BlockSpec((1, n_embd),      lambda i: (0, 0)),   # b2
            ],
            out_specs=pl.BlockSpec((tm_eff, n_embd), lambda i: (i, 0)),
        )
        kernel = _mlp_kernel_resident
        dims = ("parallel",)
    else:
        grid_spec = pltpu.PrefetchScalarGridSpec(
            num_scalar_prefetch=0,
            grid=(n_i, n_k),
            in_specs=[
                pl.BlockSpec((tm_eff, n_embd), lambda i, k: (i, 0)),   # x tile
                pl.BlockSpec((n_embd, tn_eff), lambda i, k: (0, k)),   # W1 chunk
                pl.BlockSpec((1, tn_eff),      lambda i, k: (0, k)),   # b1 chunk
                pl.BlockSpec((tn_eff, n_embd), lambda i, k: (k, 0)),   # W2 chunk
                pl.BlockSpec((1, n_embd),      lambda i, k: (0, 0)),   # b2
            ],
            out_specs=pl.BlockSpec((tm_eff, n_embd), lambda i, k: (i, 0)),
            scratch_shapes=[pltpu.VMEM((tm_eff, n_embd), jnp.float32)],
        )
        kernel = _mlp_kernel_streamed
        dims = ("parallel", "arbitrary")

    out = pl.pallas_call(
        kernel,
        out_shape=jax.ShapeDtypeStruct((M_pad, n_embd), out_dtype),
        grid_spec=grid_spec,
        compiler_params=pltpu.CompilerParams(
            dimension_semantics=dims,
            vmem_limit_bytes=vmem_limit,
        ),
        cost_estimate=cost,
    )(x_c, w1_c, b1_2d, w2_c, b2_2d)

    if M_pad != M:
        out = out[:M]
    return out


def mlp_reference(x, w1, b1, w2, b2):
    h = x @ w1 + b1
    h = 0.5 * h * (1.0 + jax.lax.erf(h * _INV_SQRT2))
    return h @ w2 + b2


if __name__ == "__main__":
    # Small GPT-style config: n_embd lane-dense, hidden = 4*n_embd.
    B, T, n_embd = 2, 8, 128
    hidden = 4 * n_embd  # 512

    key = jax.random.PRNGKey(0)
    kx, kw1, kb1, kw2, kb2 = jax.random.split(key, 5)

    # Deterministic parameter init (mimics nn.Linear uniform bounds).
    bound1 = 1.0 / math.sqrt(n_embd)
    bound2 = 1.0 / math.sqrt(hidden)
    w1 = jax.random.uniform(kw1, (n_embd, hidden), jnp.float32, -bound1, bound1)
    b1 = jax.random.uniform(kb1, (hidden,), jnp.float32, -bound1, bound1)
    w2 = jax.random.uniform(kw2, (hidden, n_embd), jnp.float32, -bound2, bound2)
    b2 = jax.random.uniform(kb2, (n_embd,), jnp.float32, -bound2, bound2)

    x = jax.random.normal(kx, (B, T, n_embd), jnp.float32)

    # Flatten (B, T, C) -> (B*T, C) for the kernel; reshape back after.
    x2d = x.reshape(B * T, n_embd)
    ref = mlp_reference(x2d, w1, b1, w2, b2)

    # 1) f32 compute path: tight check vs the f32 reference.
    out_f32 = mlp_pallas(x2d, w1, b1, w2, b2, compute_dtype=jnp.float32)
    jax.block_until_ready(out_f32)
    assert jnp.allclose(out_f32, ref, atol=1e-5, rtol=1e-5), "f32 mismatch vs reference"

    # 2) bf16 compute path (MXU rate) with weights persisted in bf16 up front
    #    (no per-call weight cast in the wrapper); looser tolerance vs f32 ref.
    w1_bf16 = w1.astype(jnp.bfloat16)
    w2_bf16 = w2.astype(jnp.bfloat16)
    out_bf16 = mlp_pallas(x2d, w1_bf16, b1, w2_bf16, b2, compute_dtype=jnp.bfloat16)
    out = out_bf16.reshape(B, T, n_embd)
    jax.block_until_ready(out)
    assert jnp.allclose(out_bf16, ref, atol=5e-2, rtol=5e-2), "bf16 mismatch vs reference"

    print("KERNEL_OK")
</pallas_src>

<mosaic_0001>
module attributes {stable_mosaic.version = 11 : i64} {
  func.func @_mlp_kernel_resident(%arg0: i32, %arg1: memref<16x128xf32, #tpu.memory_space<vmem>>, %arg2: memref<128x512xf32, #tpu.memory_space<vmem>>, %arg3: memref<1x512xf32, #tpu.memory_space<vmem>>, %arg4: memref<512x128xf32, #tpu.memory_space<vmem>>, %arg5: memref<1x128xf32, #tpu.memory_space<vmem>>, %arg6: memref<16x128xf32, #tpu.memory_space<vmem>>) attributes {dimension_semantics = [#tpu.dimension_semantics<parallel>], iteration_bounds = array<i64: 1>, scalar_prefetch = 0 : i64, scratch_operands = 0 : i64, tpu.core_type = #tpu.core_type<tc>, window_params = [{transform_indices = @transform_0, window_bounds = array<i64: 16, 128>}, {pipeline_mode = #tpu.pipeline_mode<synchronous>, transform_indices = @transform_1, window_bounds = array<i64: 128, 512>}, {pipeline_mode = #tpu.pipeline_mode<synchronous>, transform_indices = @transform_2, window_bounds = array<i64: 1, 512>}, {pipeline_mode = #tpu.pipeline_mode<synchronous>, transform_indices = @transform_3, window_bounds = array<i64: 512, 128>}, {pipeline_mode = #tpu.pipeline_mode<synchronous>, transform_indices = @transform_4, window_bounds = array<i64: 1, 128>}, {transform_indices = @transform_5, window_bounds = array<i64: 16, 128>}]} {
    %c0 = arith.constant 0 : index
    %c0_0 = arith.constant 0 : index
    %0 = vector.load %arg1[%c0, %c0_0] : memref<16x128xf32, #tpu.memory_space<vmem>>, vector<16x128xf32>
    %c0_1 = arith.constant 0 : index
    %c0_2 = arith.constant 0 : index
    %1 = vector.load %arg2[%c0_1, %c0_2] : memref<128x512xf32, #tpu.memory_space<vmem>>, vector<128x512xf32>
    %cst = arith.constant dense<0.000000e+00> : vector<16x512xf32>
    %2 = tpu.matmul %0, %1, %cst {dimension_numbers = #tpu.dot_dimension_numbers<[1], [0], [0], [1], [0, 0, 1, 1], [], []>} : vector<16x128xf32>, vector<128x512xf32>, vector<16x512xf32> -> vector<16x512xf32>
    %c0_3 = arith.constant 0 : index
    %c0_4 = arith.constant 0 : index
    %3 = vector.load %arg3[%c0_3, %c0_4] : memref<1x512xf32, #tpu.memory_space<vmem>>, vector<1x512xf32>
    %4 = vector.broadcast %3 : vector<1x512xf32> to vector<16x512xf32>
    %5 = arith.addf %2, %4 : vector<16x512xf32>
    %cst_5 = arith.constant 5.000000e-01 : f32
    %6 = vector.broadcast %cst_5 : f32 to vector<16x512xf32>
    %7 = arith.mulf %6, %5 : vector<16x512xf32>
    %cst_6 = arith.constant 0.707106769 : f32
    %8 = vector.broadcast %cst_6 : f32 to vector<16x512xf32>
    %9 = arith.mulf %5, %8 : vector<16x512xf32>
    %10 = math.erf %9 : vector<16x512xf32>
    %cst_7 = arith.constant 1.000000e+00 : f32
    %11 = vector.broadcast %cst_7 : f32 to vector<16x512xf32>
    %12 = arith.addf %11, %10 : vector<16x512xf32>
    %13 = arith.mulf %7, %12 : vector<16x512xf32>
    %c0_8 = arith.constant 0 : index
    %c0_9 = arith.constant 0 : index
    %14 = vector.load %arg4[%c0_8, %c0_9] : memref<512x128xf32, #tpu.memory_space<vmem>>, vector<512x128xf32>
    %cst_10 = arith.constant dense<0.000000e+00> : vector<16x128xf32>
    %15 = tpu.matmul %13, %14, %cst_10 {dimension_numbers = #tpu.dot_dimension_numbers<[1], [0], [0], [1], [0, 0, 1, 1], [], []>} : vector<16x512xf32>, vector<512x128xf32>, vector<16x128xf32> -> vector<16x128xf32>
    %c0_11 = arith.constant 0 : index
    %c0_12 = arith.constant 0 : index
    %16 = vector.load %arg5[%c0_11, %c0_12] : memref<1x128xf32, #tpu.memory_space<vmem>>, vector<1x128xf32>
    %17 = vector.broadcast %16 : vector<1x128xf32> to vector<16x128xf32>
    %18 = arith.addf %15, %17 : vector<16x128xf32>
    %c0_13 = arith.constant 0 : index
    %c0_14 = arith.constant 0 : index
    %19 = vector.load %arg6[%c0_13, %c0_14] : memref<16x128xf32, #tpu.memory_space<vmem>>, vector<16x128xf32>
    tpu.vector_store %arg6[%c0_13, %c0_14], %18 {strides = array<i32>} : memref<16x128xf32, #tpu.memory_space<vmem>>, vector<16x128xf32>,
    return
  }
  func.func @transform_0(%arg0: i32) -> (i32, i32) {
    %c0_i32 = arith.constant 0 : i32
    %c0_i32_0 = arith.constant 0 : i32
    return %arg0, %c0_i32 : i32, i32
  }
  func.func @transform_1(%arg0: i32) -> (i32, i32) {
    %c0_i32 = arith.constant 0 : i32
    %c0_i32_0 = arith.constant 0 : i32
    %c0_i32_1 = arith.constant 0 : i32
    return %c0_i32, %c0_i32_0 : i32, i32
  }
  func.func @transform_2(%arg0: i32) -> (i32, i32) {
    %c0_i32 = arith.constant 0 : i32
    %c0_i32_0 = arith.constant 0 : i32
    %c0_i32_1 = arith.constant 0 : i32
    return %c0_i32, %c0_i32_0 : i32, i32
  }
  func.func @transform_3(%arg0: i32) -> (i32, i32) {
    %c0_i32 = arith.constant 0 : i32
    %c0_i32_0 = arith.constant 0 : i32
    %c0_i32_1 = arith.constant 0 : i32
    return %c0_i32, %c0_i32_0 : i32, i32
  }
  func.func @transform_4(%arg0: i32) -> (i32, i32) {
    %c0_i32 = arith.constant 0 : i32
    %c0_i32_0 = arith.constant 0 : i32
    %c0_i32_1 = arith.constant 0 : i32
    return %c0_i32, %c0_i32_0 : i32, i32
  }
  func.func @transform_5(%arg0: i32) -> (i32, i32) {
    %c0_i32 = arith.constant 0 : i32
    %c0_i32_0 = arith.constant 0 : i32
    return %arg0, %c0_i32 : i32, i32
  }
}

</mosaic_0001>

<bundles_post_ra>
// kernel: tpu_custom_call.1
= control target key start
LH: loop header
LB: loop body
LE: loop exit
PB: predicated region body
PF: predicated region fallthrough
CT: control target
= control target key end

     0   :  { %10 = vsyncpa [#allocation3], 0  ;;  %s1327_s0 = inlined_call_operand.hbm [shape: f32[16,128], index: 0, kind: input, shape index: {}]   ;;  %s1328_s1 = inlined_call_operand.hbm [shape: f32[128,512], index: 1, kind: input, shape index: {}]   ;;  %s1329_s2 = inlined_call_operand.hbm [shape: f32[1,512], index: 2, kind: input, shape index: {}]   ;;  %s1330_s3 = inlined_call_operand.hbm [shape: f32[512,128], index: 3, kind: input, shape index: {}]   ;;  %s1331_s4 = inlined_call_operand.vmem [shape: f32[1,128], index: 4, kind: input, shape index: {}]   ;;  %s1332_s5 = inlined_call_operand.hbm [shape: f32[16,128], index: 5, kind: output, shape index: {}]  }
   0x1   :  { %11 = vsyncpa [#allocation6], 0 }
   0x2   :  { %12 = vsyncpa [#allocation9], 0  ;;  %s31_s20 = sshll.u32 %s1328_s1, 4  ;;  %s32_s20 = int_to_ptr.hbm [resolvable:$true] %s31_s20 }
   0x3   :  { %13 = vsyncpa [#allocation4], 0  ;;  %s947_s21 = smov [#allocation5]   ;;  %s18_s25 = sshll.u32 %s1327_s0, 4  ;;  %s19_s25 = int_to_ptr.hbm [resolvable:$true] %s18_s25 }
   0x4   :  { %s33_s22 = sshll.u32 %s947_s21, 4  ;;  %s948_s26 = smov 512   ;;  %s34_s22 = int_to_ptr.vmem [resolvable:$true] %s33_s22 }
   0x5   :  { %s949_s27 = smov 32   ;;  %s950_s28 = smov [#allocation2]  }
   0x6   :  { %39 = dma.hbm_to_vmem [thread:$0]  %s32_s20, 8192, %s34_s22, [#allocation6], %s948_s26, %s948_s26, %s949_s27  }
   0x7   :  { %s20_s29 = sshll.u32 %s950_s28, 4  ;;  %s951_s30 = smov 128   ;;  %s21_s29 = int_to_ptr.vmem [resolvable:$true] %s20_s29 }
   0x8   :  { %s952_s6 = smov 8   ;;  %s45_s8 = sshll.u32 %s1329_s2, 4  ;;  %s46_s8 = int_to_ptr.hbm [resolvable:$true] %s45_s8 }
   0x9   :  { %26 = dma.hbm_to_vmem [thread:$0]  %s19_s25, 256, %s21_s29, [#allocation3], %s951_s30, %s951_s30, %s952_s6  }
   0xa   :  { %s953_s9 = smov [#allocation7]   ;;  %s55_s12 = sshll.u32 %s1330_s3, 4  ;;  %s56_s12 = int_to_ptr.hbm [resolvable:$true] %s55_s12 }
   0xb   :  { %s47_s0 = sshll.u32 %s953_s9, 4  ;;  %s954_s13 = smov [#allocation8]   ;;  %s48_s0 = int_to_ptr.vmem [resolvable:$true] %s47_s0 }
   0xc   :  { %50 = dma.hbm_to_vmem [thread:$0]  %s46_s8, 64, %s48_s0, [#allocation6]  }
   0xd   :  { %s57_s14 = sshll.u32 %s954_s13, 4  ;;  %s58_s14 = int_to_ptr.vmem [resolvable:$true] %s57_s14 }
   0xe   :  { %63 = dma.hbm_to_vmem [thread:$0]  %s56_s12, 8192, %s58_s14, [#allocation9], %s951_s30, %s951_s30, %s952_s6  }
   0xf   :  { %939 = dma.done.wait [#allocation3], 256  }
  0x10   :  { %940 = vsyncadd [#allocation3], 4294967040 }
  0x11   :  { %941 = dma.done.wait [#allocation6], 8256  }
  0x12   :  { %942 = vsyncadd [#allocation6], 4294959040 }
  0x13   :  { %943 = dma.done.wait [#allocation9], 8192  }
  0x14   :  { %944 = vsyncadd [#allocation9], 4294959104  ;;  %v144_v0 = vld [vmem:[#allocation5 + $0x1e0] sm:$0xff]  ;;  %v145_v1 = vld [vmem:[#allocation5 + $0x1e8] sm:$0xff]  ;;  %s955_s15 = smov [#allocation10]  }
  0x15   :  { %v146_v2 = vld [vmem:[#allocation5 + $0x1f0] sm:$0xff]  ;;  %158 = vmatpush.msra.mxu0 %v144_v0  ;;  %181 = vmatpush.msra.mxu1 %v145_v1  ;;  %v147_v3 = vld [vmem:[#allocation5 + $0x1f8] sm:$0xff]  ;;  %v140_v4 = vld [vmem:[#allocation5 + $0x1c0] sm:$0xff]  ;;  %s768_s16 = sshll.u32 %s955_s15, 4  ;;  %s769_s16 = int_to_ptr.vmem [resolvable:$true] %s768_s16 }
  0x16   :  { %v141_v5 = vld [vmem:[#allocation5 + $0x1c8] sm:$0xff]  ;;  %204 = vmatpush.msra.mxu2 %v146_v2  ;;  %227 = vmatpush.msra.mxu3 %v147_v3  ;;  %v142_v6 = vld [vmem:[#allocation5 + $0x1d0] sm:$0xff]  ;;  %v143_v7 = vld [vmem:[#allocation5 + $0x1d8] sm:$0xff] }
  0x17   :  { %v136_v8 = vld [vmem:[#allocation5 + $0x1a0] sm:$0xff]  ;;  %159 = vmatpush.msra.mxu0 %v140_v4  ;;  %182 = vmatpush.msra.mxu1 %v141_v5  ;;  %v137_v9 = vld [vmem:[#allocation5 + $0x1a8] sm:$0xff]  ;;  %v138_v10 = vld [vmem:[#allocation5 + $0x1b0] sm:$0xff] }
  0x18   :  { %v139_v11 = vld [vmem:[#allocation5 + $0x1b8] sm:$0xff]  ;;  %205 = vmatpush.msra.mxu2 %v142_v6  ;;  %228 = vmatpush.msra.mxu3 %v143_v7  ;;  %v132_v12 = vld [vmem:[#allocation5 + $0x180] sm:$0xff]  ;;  %v133_v13 = vld [vmem:[#allocation5 + $0x188] sm:$0xff] }
  0x19   :  { %160 = vmatpush.msra.mxu0 %v136_v8  ;;  %183 = vmatpush.msra.mxu1 %v137_v9  ;;  %v134_v14 = vld [vmem:[#allocation5 + $0x190] sm:$0xff]  ;;  %v135_v15 = vld [vmem:[#allocation5 + $0x198] sm:$0xff]  ;;  %v128_v16 = vld [vmem:[#allocation5 + $0x160] sm:$0xff] }
  0x1a   :  { %206 = vmatpush.msra.mxu2 %v138_v10  ;;  %229 = vmatpush.msra.mxu3 %v139_v11  ;;  %v129_v17 = vld [vmem:[#allocation5 + $0x168] sm:$0xff]  ;;  %v130_v18 = vld [vmem:[#allocation5 + $0x170] sm:$0xff]  ;;  %v131_v19 = vld [vmem:[#allocation5 + $0x178] sm:$0xff] }
  0x1b   :  { %161 = vmatpush.msra.mxu0 %v132_v12  ;;  %184 = vmatpush.msra.mxu1 %v133_v13  ;;  %v124_v20 = vld [vmem:[#allocation5 + $0x140] sm:$0xff]  ;;  %v125_v21 = vld [vmem:[#allocation5 + $0x148] sm:$0xff]  ;;  %v126_v22 = vld [vmem:[#allocation5 + $0x150] sm:$0xff] }
  0x1c   :  { %207 = vmatpush.msra.mxu2 %v134_v14  ;;  %230 = vmatpush.msra.mxu3 %v135_v15  ;;  %v127_v23 = vld [vmem:[#allocation5 + $0x158] sm:$0xff]  ;;  %v120_v24 = vld [vmem:[#allocation5 + $0x120] sm:$0xff]  ;;  %v121_v25 = vld [vmem:[#allocation5 + $0x128] sm:$0xff] }
  0x1d   :  { %162 = vmatpush.msra.mxu0 %v128_v16  ;;  %185 = vmatpush.msra.mxu1 %v129_v17  ;;  %v122_v26 = vld [vmem:[#allocation5 + $0x130] sm:$0xff]  ;;  %v123_v27 = vld [vmem:[#allocation5 + $0x138] sm:$0xff]  ;;  %v116_v28 = vld [vmem:[#allocation5 + $0x100] sm:$0xff] }
  0x1e   :  { %208 = vmatpush.msra.mxu2 %v130_v18  ;;  %231 = vmatpush.msra.mxu3 %v131_v19  ;;  %v117_v29 = vld [vmem:[#allocation5 + $0x108] sm:$0xff]  ;;  %v118_v30 = vld [vmem:[#allocation5 + $0x110] sm:$0xff]  ;;  %v119_v31 = vld [vmem:[#allocation5 + $0x118] sm:$0xff] }
  0x1f   :  { %163 = vmatpush.msra.mxu0 %v124_v20  ;;  %186 = vmatpush.msra.mxu1 %v125_v21  ;;  %v112_v32 = vld [vmem:[#allocation5 + $0xe0] sm:$0xff]  ;;  %v113_v33 = vld [vmem:[#allocation5 + $0xe8] sm:$0xff]  ;;  %v114_v34 = vld [vmem:[#allocation5 + $0xf0] sm:$0xff] }
  0x20   :  { %209 = vmatpush.msra.mxu2 %v126_v22  ;;  %232 = vmatpush.msra.mxu3 %v127_v23  ;;  %v115_v35 = vld [vmem:[#allocation5 + $0xf8] sm:$0xff]  ;;  %v108_v36 = vld [vmem:[#allocation5 + $0xc0] sm:$0xff]  ;;  %v109_v37 = vld [vmem:[#allocation5 + $0xc8] sm:$0xff] }
  0x21   :  { %164 = vmatpush.msra.mxu0 %v120_v24  ;;  %187 = vmatpush.msra.mxu1 %v121_v25  ;;  %v110_v38 = vld [vmem:[#allocation5 + $0xd0] sm:$0xff]  ;;  %v111_v39 = vld [vmem:[#allocation5 + $0xd8] sm:$0xff]  ;;  %v104_v40 = vld [vmem:[#allocation5 + $0xa0] sm:$0xff] }
  0x22   :  { %210 = vmatpush.msra.mxu2 %v122_v26  ;;  %233 = vmatpush.msra.mxu3 %v123_v27  ;;  %v105_v41 = vld [vmem:[#allocation5 + $0xa8] sm:$0xff]  ;;  %v106_v42 = vld [vmem:[#allocation5 + $0xb0] sm:$0xff]  ;;  %v107_v43 = vld [vmem:[#allocation5 + $0xb8] sm:$0xff] }
  0x23   :  { %165 = vmatpush.msra.mxu0 %v116_v28  ;;  %188 = vmatpush.msra.mxu1 %v117_v29  ;;  %v100_v44 = vld [vmem:[#allocation5 + $0x80] sm:$0xff]  ;;  %v101_v45 = vld [vmem:[#allocation5 + $0x88] sm:$0xff]  ;;  %v102_v46 = vld [vmem:[#allocation5 + $0x90] sm:$0xff] }
  0x24   :  { %211 = vmatpush.msra.mxu2 %v118_v30  ;;  %234 = vmatpush.msra.mxu3 %v119_v31  ;;  %v103_v47 = vld [vmem:[#allocation5 + $0x98] sm:$0xff]  ;;  %v96_v48 = vld [vmem:[#allocation5 + $0x60] sm:$0xff]  ;;  %v97_v49 = vld [vmem:[#allocation5 + $0x68] sm:$0xff] }
  0x25   :  { %166 = vmatpush.msra.mxu0 %v112_v32  ;;  %189 = vmatpush.msra.mxu1 %v113_v33  ;;  %v98_v50 = vld [vmem:[#allocation5 + $0x70] sm:$0xff]  ;;  %v99_v51 = vld [vmem:[#allocation5 + $0x78] sm:$0xff]  ;;  %v92_v52 = vld [vmem:[#allocation5 + $0x40] sm:$0xff] }
  0x26   :  { %212 = vmatpush.msra.mxu2 %v114_v34  ;;  %235 = vmatpush.msra.mxu3 %v115_v35  ;;  %v93_v53 = vld [vmem:[#allocation5 + $0x48] sm:$0xff]  ;;  %v94_v54 = vld [vmem:[#allocation5 + $0x50] sm:$0xff]  ;;  %v95_v55 = vld [vmem:[#allocation5 + $0x58] sm:$0xff] }
  0x27   :  { %167 = vmatpush.msra.mxu0 %v108_v36  ;;  %190 = vmatpush.msra.mxu1 %v109_v37  ;;  %v88_v56 = vld [vmem:[#allocation5 + $0x20] sm:$0xff]  ;;  %v89_v57 = vld [vmem:[#allocation5 + $0x28] sm:$0xff]  ;;  %v90_v58 = vld [vmem:[#allocation5 + $0x30] sm:$0xff] }
  0x28   :  { %213 = vmatpush.msra.mxu2 %v110_v38  ;;  %236 = vmatpush.msra.mxu3 %v111_v39  ;;  %v91_v59 = vld [vmem:[#allocation5 + $0x38] sm:$0xff]  ;;  %v84_v60 = vld [vmem:[#allocation5] sm:$0xff]  ;;  %v85_v61 = vld [vmem:[#allocation5 + $0x8] sm:$0xff] }
  0x29   :  { %168 = vmatpush.msra.mxu0 %v104_v40  ;;  %191 = vmatpush.msra.mxu1 %v105_v41  ;;  %v86_v62 = vld [vmem:[#allocation5 + $0x10] sm:$0xff]  ;;  %v87_v63 = vld [vmem:[#allocation5 + $0x18] sm:$0xff]  ;;  %v1004_v2 = vld [vmem:[#allocation7] sm:$0xf] }
  0x2a   :  { %214 = vmatpush.msra.mxu2 %v106_v42  ;;  %237 = vmatpush.msra.mxu3 %v107_v43  ;;  %v82_v0 = vld [vmem:[#allocation2] sm:$0xff]  ;;  %v83_v1 = vld [vmem:[#allocation2 + $0x8] sm:$0xff]  ;;  %v150_v3 = vperm.slane %v1004_v2, 0  ;;  %v151_v4 = vperm.slane %v1004_v2, 1  ;;  %v152_v11 = vperm.slane %v1004_v2, 2  ;;  %v153_v12 = vperm.slane %v1004_v2, 3 }
  0x2b   :  { %169 = vmatpush.msra.mxu0 %v100_v44  ;;  %192 = vmatpush.msra.mxu1 %v101_v45 }
  0x2c   :  { %215 = vmatpush.msra.mxu2 %v102_v46  ;;  %238 = vmatpush.msra.mxu3 %v103_v47 }
  0x2d   :  { %170 = vmatpush.msra.mxu0 %v96_v48  ;;  %193 = vmatpush.msra.mxu1 %v97_v49 }
  0x2e   :  { %216 = vmatpush.msra.mxu2 %v98_v50  ;;  %239 = vmatpush.msra.mxu3 %v99_v51 }
  0x2f   :  { %171 = vmatpush.msra.mxu0 %v92_v52  ;;  %194 = vmatpush.msra.mxu1 %v93_v53 }
  0x30   :  { %217 = vmatpush.msra.mxu2 %v94_v54  ;;  %240 = vmatpush.msra.mxu3 %v95_v55 }
  0x31   :  { %172 = vmatpush.msra.mxu0 %v88_v56  ;;  %195 = vmatpush.msra.mxu1 %v89_v57 }
  0x32   :  { %218 = vmatpush.msra.mxu2 %v90_v58  ;;  %241 = vmatpush.msra.mxu3 %v91_v59 }
  0x33   :  { %173 = vmatpush.msra.mxu0 %v84_v60  ;;  %196 = vmatpush.msra.mxu1 %v85_v61 }
  0x34   :  { %219 = vmatpush.msra.mxu2 %v86_v62  ;;  %242 = vmatpush.msra.mxu3 %v87_v63 }
  0x35   :  { %174 = vmatmul.f32.vlgmr.msra.gmra.mxu0 %v82_v0  ;;  %197 = vmatmul.f32.vlgmr.msra.gmra.mxu1 %v82_v0 }
  0x36   :  { %220 = vmatmul.f32.vlgmr.msra.gmra.mxu2 %v82_v0  ;;  %243 = vmatmul.f32.vlgmr.msra.gmra.mxu3 %v82_v0  ;;  %v617_v0 = vld [vmem:[#allocation8 + $0x78] sm:$0xff] }
  0x37   :  { %670 = vmatpush.msrb.mxu0 %v617_v0 }
  0x3d   :  { %177 = vmatmul.f32.gmra.mxu0 %v83_v1  ;;  %200 = vmatmul.f32.gmra.mxu1 %v83_v1 }
  0x3e   :  { %223 = vmatmul.f32.gmra.mxu2 %v83_v1  ;;  %246 = vmatmul.f32.gmra.mxu3 %v83_v1  ;;  %v633_v1 = vld [vmem:[#allocation8 + $0xf8] sm:$0xff] }
  0x3f   :  { %693 = vmatpush.msrb.mxu1 %v633_v1  ;;  %v612_v1 = vld [vmem:[#allocation8 + $0x50] sm:$0xff] }
  0xb2   :  { %v175_v5 = vpop.f32.mrf.mxu0  ;;  %v198_v6 = vpop.f32.mrf.mxu1 }
  0xb3   :  { %v1008_v7 = vadd.f32 %v175_v5, %v150_v3  ;;  %v1012_v8 = vadd.f32 %v198_v6, %v151_v4 }
  0xb5   :  { %v1015_v9 = vmul.f32 0.70710677, %v1008_v7  ;;  %v1018_v10 = vmul.f32 0.70710677, %v1012_v8 }
  0xb7   :  { %v266_v13 = vmul.f32 %v1015_v9, %v1015_v9  ;;  %v306_v14 = vmul.f32 %v1018_v10, %v1018_v10 }
  0xb9   :  { %v1026_v15 = vmin.f32 %v266_v13, 16.0  ;;  %v1028_v16 = vmin.f32 %v306_v14, 16.0  ;;  %v221_v17 = vpop.f32.mrf.mxu2  ;;  %v244_v18 = vpop.f32.mrf.mxu3 }
  0xba   :  { %v1032_v19 = vadd.f32 %v221_v17, %v152_v11  ;;  %v1036_v20 = vadd.f32 %v244_v18, %v153_v12  ;;  %v178_v44 = vpop.f32.mrf.mxu0 }
  0xbb   :  { %v268_v21 = vmul.f32 2.1237322e-06, %v1026_v15  ;;  %v279_v22 = vmul.f32 3.8918573e-05, %v1026_v15  ;;  %v308_v23 = vmul.f32 2.1237322e-06, %v1028_v16  ;;  %v1066_v55 = vadd.f32 %v178_v44, %v150_v3 }
  0xbc   :  { %v319_v24 = vmul.f32 3.8918573e-05, %v1028_v16  ;;  %v1043_v25 = vmul.f32 0.70710677, %v1032_v19  ;;  %v1048_v31 = vmul.f32 0.70710677, %v1036_v20 }
  0xbd   :  { %v269_v26 = vadd.f32 0.00028619796, %v268_v21  ;;  %v280_v27 = vadd.f32 0.001143296, %v279_v22  ;;  %v309_v28 = vadd.f32 0.00028619796, %v308_v23 }
  0xbe   :  { %v320_v29 = vadd.f32 0.001143296, %v319_v24  ;;  %v346_v30 = vmul.f32 %v1043_v25, %v1043_v25  ;;  %v386_v37 = vmul.f32 %v1048_v31, %v1048_v31  ;;  %v1079_v23 = vmul.f32 0.70710677, %v1066_v55  ;;  %v616_v24 = vld [vmem:[#allocation8 + $0x70] sm:$0xff]  ;;  %v649_v44 = vld [vmem:[#allocation8 + $0x178] sm:$0xff] }
  0xbf   :  { %v270_v32 = vmul.f32 %v269_v26, %v1026_v15  ;;  %v281_v33 = vmul.f32 %v280_v27, %v1026_v15  ;;  %v310_v34 = vmul.f32 %v309_v28, %v1028_v16  ;;  %v632_v26 = vld [vmem:[#allocation8 + $0xf0] sm:$0xff]  ;;  %671 = vmatpush.msrb.mxu0 %v616_v24  ;;  %716 = vmatpush.msrb.mxu2 %v649_v44 }
  0xc0   :  { %v321_v35 = vmul.f32 %v320_v29, %v1028_v16  ;;  %v1054_v36 = vmin.f32 %v346_v30, 16.0  ;;  %v1063_v48 = vmin.f32 %v386_v37, 16.0  ;;  %694 = vmatpush.msrb.mxu1 %v632_v26  ;;  %v615_v30 = vld [vmem:[#allocation8 + $0x68] sm:$0xff] }
  0xc1   :  { %v271_v38 = vadd.f32 0.0036580483, %v270_v32  ;;  %v282_v39 = vadd.f32 0.014752088, %v281_v33  ;;  %v311_v40 = vadd.f32 0.0036580483, %v310_v34  ;;  %672 = vmatpush.msrb.mxu0 %v615_v30 }
  0xc2   :  { %v322_v41 = vadd.f32 0.014752088, %v321_v35  ;;  %v348_v42 = vmul.f32 2.1237322e-06, %v1054_v36  ;;  %v359_v43 = vmul.f32 3.8918573e-05, %v1054_v36 }
  0xc3   :  { %v272_v45 = vmul.f32 %v271_v38, %v1026_v15  ;;  %v283_v46 = vmul.f32 %v282_v39, %v1026_v15  ;;  %v312_v47 = vmul.f32 %v311_v40, %v1028_v16  ;;  %v388_v59 = vmul.f32 2.1237322e-06, %v1063_v48  ;;  %v631_v32 = vld [vmem:[#allocation8 + $0xe8] sm:$0xff]  ;;  %v614_v40 = vld [vmem:[#allocation8 + $0x60] sm:$0xff] }
  0xc4   :  { %v323_v49 = vmul.f32 %v322_v41, %v1028_v16  ;;  %v349_v50 = vadd.f32 0.00028619796, %v348_v42  ;;  %v360_v51 = vadd.f32 0.001143296, %v359_v43  ;;  %v399_v63 = vmul.f32 3.8918573e-05, %v1063_v48  ;;  %695 = vmatpush.msrb.mxu1 %v631_v32  ;;  %673 = vmatpush.msrb.mxu0 %v614_v40 }
  0xc5   :  { %v273_v52 = vadd.f32 0.05243302, %v272_v45  ;;  %v284_v53 = vadd.f32 0.112945676, %v283_v46  ;;  %v313_v54 = vadd.f32 0.05243302, %v312_v47  ;;  %v201_v47 = vpop.f32.mrf.mxu1 }
  0xc6   :  { %v324_v56 = vadd.f32 0.112945676, %v323_v49  ;;  %v350_v57 = vmul.f32 %v349_v50, %v1054_v36  ;;  %v361_v58 = vmul.f32 %v360_v51, %v1054_v36  ;;  %v389_v13 = vadd.f32 0.00028619796, %v388_v59  ;;  %v630_v43 = vld [vmem:[#allocation8 + $0xe0] sm:$0xff]  ;;  %v665_v45 = vld [vmem:[#allocation8 + $0x1f8] sm:$0xff] }
  0xc7   :  { %v274_v60 = vmul.f32 %v273_v52, %v1026_v15  ;;  %v285_v61 = vmul.f32 %v284_v53, %v1026_v15  ;;  %v314_v62 = vmul.f32 %v313_v54, %v1028_v16  ;;  %v400_v29 = vadd.f32 0.001143296, %v399_v63  ;;  %696 = vmatpush.msrb.mxu1 %v630_v43  ;;  %v613_v49 = vld [vmem:[#allocation8 + $0x58] sm:$0xff]  ;;  %v648_v51 = vld [vmem:[#allocation8 + $0x170] sm:$0xff]  ;;  %739 = vmatpush.msrb.mxu3 %v665_v45  ;;  %v662_v30 = vld [vmem:[#allocation8 + $0x1e0] sm:$0xff] }
  0xc8   :  { %v325_v3 = vmul.f32 %v324_v56, %v1028_v16  ;;  %v351_v5 = vadd.f32 0.0036580483, %v350_v57  ;;  %v362_v6 = vadd.f32 0.014752088, %v361_v58  ;;  %v390_v22 = vmul.f32 %v389_v13, %v1063_v48  ;;  %v629_v50 = vld [vmem:[#allocation8 + $0xd8] sm:$0xff]  ;;  %v224_v56 = vpop.f32.mrf.mxu2  ;;  %v247_v57 = vpop.f32.mrf.mxu3  ;;  %674 = vmatpush.msrb.mxu0 %v613_v49  ;;  %717 = vmatpush.msrb.mxu2 %v648_v51  ;;  %v644_v49 = vld [vmem:[#allocation8 + $0x150] sm:$0xff] }
  0xc9   :  { %v275_v14 = vadd.f32 0.18741608, %v274_v60  ;;  %v286_v17 = vadd.f32 0.4994258, %v285_v61  ;;  %v315_v28 = vadd.f32 0.18741608, %v314_v62  ;;  %v401_v46 = vmul.f32 %v400_v29, %v1063_v48  ;;  %697 = vmatpush.msrb.mxu1 %v629_v50 }
  0xca   :  { %v326_v18 = vadd.f32 0.4994258, %v325_v3  ;;  %v363_v21 = vmul.f32 %v362_v6, %v1054_v36  ;;  %v352_v35 = vmul.f32 %v351_v5, %v1054_v36  ;;  %v391_v39 = vadd.f32 0.0036580483, %v390_v22  ;;  %v628_v3 = vld [vmem:[#allocation8 + $0xd0] sm:$0xff]  ;;  %675 = vmatpush.msrb.mxu0 %v612_v1  ;;  %v646_v29 = vld [vmem:[#allocation8 + $0x160] sm:$0xff] }
  0xcb   :  { %v287_v27 = vmul.f32 %v286_v17, %v1026_v15  ;;  %v276_v33 = vmul.f32 %v275_v14, %v1026_v15  ;;  %v316_v15 = vmul.f32 %v315_v28, %v1028_v16  ;;  %v426_v54 = vmul.f32 %v1079_v23, %v1079_v23  ;;  %698 = vmatpush.msrb.mxu1 %v628_v3  ;;  %v647_v14 = vld [vmem:[#allocation8 + $0x168] sm:$0xff]  ;;  %v661_v43 = vld [vmem:[#allocation8 + $0x1d8] sm:$0xff] }
  0xcc   :  { %v327_v34 = vmul.f32 %v326_v18, %v1028_v16  ;;  %v364_v37 = vadd.f32 0.112945676, %v363_v21  ;;  %v353_v53 = vadd.f32 0.05243302, %v352_v35  ;;  %v664_v16 = vld [vmem:[#allocation8 + $0x1f0] sm:$0xff]  ;;  %v392_v58 = vmul.f32 %v391_v39, %v1063_v48  ;;  %718 = vmatpush.msrb.mxu2 %v647_v14  ;;  %v611_v21 = vld [vmem:[#allocation8 + $0x48] sm:$0xff] }
  0xcd   :  { %v1085_v38 = vadd.f32 1.0, %v287_v27  ;;  %v277_v52 = vadd.f32 1.1283791, %v276_v33  ;;  %v1099_v60 = vadd.f32 %v201_v47, %v151_v4  ;;  %740 = vmatpush.msrb.mxu3 %v664_v16  ;;  %v317_v61 = vadd.f32 1.1283791, %v316_v15  ;;  %676 = vmatpush.msrb.mxu0 %v611_v21  ;;  %v627_v28 = vld [vmem:[#allocation8 + $0xc8] sm:$0xff] }
  0xce   :  { %v1087_v41 = vadd.f32 1.0, %v327_v34  ;;  %v365_v42 = vmul.f32 %v364_v37, %v1054_v36  ;;  %v402_v62 = vadd.f32 0.014752088, %v401_v46  ;;  %v1103_v63 = vadd.f32 %v224_v56, %v152_v11  ;;  %v663_v11 = vld [vmem:[#allocation8 + $0x1e8] sm:$0xff]  ;;  %699 = vmatpush.msrb.mxu1 %v627_v28  ;;  %719 = vmatpush.msrb.mxu2 %v646_v29  ;;  %v610_v37 = vld [vmem:[#allocation8 + $0x40] sm:$0xff]  ;;  %v609_v46 = vld [vmem:[#allocation8 + $0x38] sm:$0xff] }
  0xcf   :  { %803 = vrcp.f32 %v1085_v38  ;;  %v1107_v0 = vadd.f32 %v247_v57, %v153_v12  ;;  %v1110_v5 = vmul.f32 %v277_v52, %v1015_v9  ;;  %v354_v4 = vmul.f32 %v353_v53, %v1054_v36  ;;  %741 = vmatpush.msrb.mxu3 %v663_v11  ;;  %v626_v39 = vld [vmem:[#allocation8 + $0xc0] sm:$0xff]  ;;  %677 = vmatpush.msrb.mxu0 %v610_v37  ;;  %v625_v47 = vld [vmem:[#allocation8 + $0xb8] sm:$0xff]  ;;  %v608_v56 = vld [vmem:[#allocation8 + $0x30] sm:$0xff] }
  0xd0   :  { %805 = vrcp.f32 %v1087_v41  ;;  %v366_v59 = vadd.f32 0.4994258, %v365_v42  ;;  %v1114_v13 = vmin.f32 %v426_v54, 16.0  ;;  %v298_v2 = vand.u32 2147483647, %v1085_v38  ;;  %700 = vmatpush.msrb.mxu1 %v626_v39  ;;  %v660_v54 = vld [vmem:[#allocation8 + $0x1d0] sm:$0xff] }
  0xd1   :  { %v300_v12 = vand.u32 2147483648, %v1085_v38  ;;  %v393_v18 = vadd.f32 0.05243302, %v392_v58  ;;  %v403_v9 = vmul.f32 %v402_v62, %v1063_v48  ;;  %vm294_vm0 = vweird.f32 %v1085_v38  ;;  %742 = vmatpush.msrb.mxu3 %v662_v30  ;;  %678 = vmatpush.msrb.mxu0 %v609_v46  ;;  %v624_v57 = vld [vmem:[#allocation8 + $0xb0] sm:$0xff]  ;;  %v643_v62 = vld [vmem:[#allocation8 + $0x148] sm:$0xff]  ;;  %v606_v28 = vld [vmem:[#allocation8 + $0x20] sm:$0xff] }
  0xd2   :  { %v367_v6 = vmul.f32 %v366_v59, %v1054_v36  ;;  %v1129_v27 = vmul.f32 0.70710677, %v1099_v60  ;;  %v1132_v32 = vmul.f32 %v317_v61, %v1018_v10  ;;  %v338_v34 = vand.u32 2147483647, %v1087_v41  ;;  %v645_v10 = vld [vmem:[#allocation8 + $0x158] sm:$0xff]  ;;  %701 = vmatpush.msrb.mxu1 %v625_v47  ;;  %v607_v14 = vld [vmem:[#allocation8 + $0x28] sm:$0xff] }
  0xd3   :  { %v404_v35 = vadd.f32 0.112945676, %v403_v9  ;;  %v340_v42 = vand.u32 2147483648, %v1087_v41  ;;  %vm334_vm2 = vweird.f32 %v1087_v41  ;;  %v1143_v15 = vmul.f32 0.70710677, %v1103_v63  ;;  %720 = vmatpush.msrb.mxu2 %v645_v10  ;;  %743 = vmatpush.msrb.mxu3 %v661_v43  ;;  %v623_v11 = vld [vmem:[#allocation8 + $0xa8] sm:$0xff] }
  0xd4   :  { %v1126_v26 = vadd.f32 1.0, %v367_v6  ;;  %v355_v51 = vadd.f32 0.18741608, %v354_v4  ;;  %v394_v52 = vmul.f32 %v393_v18, %v1063_v48  ;;  %v466_v53 = vmul.f32 %v1129_v27, %v1129_v27  ;;  %679 = vmatpush.msrb.mxu0 %v608_v56  ;;  %v659_v6 = vld [vmem:[#allocation8 + $0x1c8] sm:$0xff]  ;;  %702 = vmatpush.msrb.mxu1 %v624_v57  ;;  %v622_v39 = vld [vmem:[#allocation8 + $0xa0] sm:$0xff]  ;;  %v657_v43 = vld [vmem:[#allocation8 + $0x1b8] sm:$0xff] }
  0xd5   :  { %v1116_v17 = vpop.eup %803  ;;  %v405_v45 = vmul.f32 %v404_v35, %v1063_v48  ;;  %v428_v61 = vmul.f32 2.1237322e-06, %v1114_v13  ;;  %721 = vmatpush.msrb.mxu2 %v644_v49  ;;  %vm1161_vm5 = vcmp.eq.f32.partialorder %v298_v2, 8.507059e+37  ;;  %vm1165_vm6 = vcmp.eq.f32.partialorder %v338_v34, 8.507059e+37  ;;  %744 = vmatpush.msrb.mxu3 %v660_v54  ;;  %v640_v49 = vld [vmem:[#allocation8 + $0x130] sm:$0xff]  ;;  %v619_v4 = vld [vmem:[#allocation8 + $0x88] sm:$0xff] }
  0xd6   :  { %v1121_v22 = vpop.eup %805  ;;  %v290_v24 = vmul.f32 %v1116_v17, %v1085_v38  ;;  %vm295_vm1 = vweird.f32 %v1116_v17  ;;  %807 = vrcp.f32 %v1126_v26  ;;  %v301_v38 = vor.u32 1.1754944e-38, %v300_v12  ;;  %v642_v12 = vld [vmem:[#allocation8 + $0x140] sm:$0xff]  ;;  %680 = vmatpush.msrb.mxu0 %v607_v14  ;;  %703 = vmatpush.msrb.mxu1 %v623_v11  ;;  %v604_v16 = vld [vmem:[#allocation8 + $0x10] sm:$0xff] }
  0xd7   :  { %v330_v33 = vmul.f32 %v1121_v22, %v1087_v41  ;;  %vm1153_vm3 = vmor %vm294_vm0, %vm295_vm1  ;;  %vm335_vm4 = vweird.f32 %v1121_v22  ;;  %v406_v59 = vadd.f32 0.4994258, %v405_v45  ;;  %v1171_v21 = vmin.f32 %v466_v53, 16.0  ;;  %722 = vmatpush.msrb.mxu2 %v643_v62  ;;  %745 = vmatpush.msrb.mxu3 %v659_v6  ;;  %v638_v6 = vld [vmem:[#allocation8 + $0x120] sm:$0xff] }
  0xd8   :  { %v291_v40 = vsub.f32 1.0, %v290_v24  ;;  %v506_v2 = vmul.f32 %v1143_v15, %v1143_v15  ;;  %v658_v24 = vld [vmem:[#allocation8 + $0x1c0] sm:$0xff]  ;;  %vm1184_vm7 = vmor %vm334_vm2, %vm335_vm4  ;;  %v341_v34 = vor.u32 1.1754944e-38, %v340_v42  ;;  %v356_v35 = vmul.f32 %v355_v51, %v1054_v36  ;;  %v641_v42 = vld [vmem:[#allocation8 + $0x138] sm:$0xff]  ;;  %681 = vmatpush.msrb.mxu0 %v606_v28  ;;  %704 = vmatpush.msrb.mxu1 %v622_v39 }
  0xd9   :  { %v331_v44 = vsub.f32 1.0, %v330_v33  ;;  %v407_v9 = vmul.f32 %v406_v59, %v1063_v48  ;;  %v395_v37 = vadd.f32 0.18741608, %v394_v52  ;;  %v429_v10 = vadd.f32 0.00028619796, %v428_v61  ;;  %723 = vmatpush.msrb.mxu2 %v642_v12  ;;  %v605_v36 = vld [vmem:[#allocation8 + $0x18] sm:$0xff]  ;;  %746 = vmatpush.msrb.mxu3 %v658_v24 }
  0xda   :  { %v292_v50 = vmul.f32 %v1116_v17, %v291_v40  ;;  %v1202_v47 = vmul.f32 0.70710677, %v1107_v0  ;;  %v468_v52 = vmul.f32 2.1237322e-06, %v1171_v21  ;;  %v1206_v53 = vmin.f32 %v506_v2, 16.0  ;;  %682 = vmatpush.msrb.mxu0 %v605_v36  ;;  %v602_v2 = vld [vmem:[#allocation8] sm:$0xff] }
  0xdb   :  { %v332_v58 = vmul.f32 %v1121_v22, %v331_v44  ;;  %v1199_v46 = vadd.f32 1.0, %v407_v9  ;;  %724 = vmatpush.msrb.mxu2 %v641_v42  ;;  %v357_v56 = vadd.f32 1.1283791, %v356_v35  ;;  %v380_v57 = vand.u32 2147483648, %v1126_v26  ;;  %747 = vmatpush.msrb.mxu3 %v657_v43  ;;  %v637_v33 = vld [vmem:[#allocation8 + $0x118] sm:$0xff]  ;;  %v636_v36 = vld [vmem:[#allocation8 + $0x110] sm:$0xff] }
  0xdc   :  { %v293_v1 = vadd.f32 %v1116_v17, %v292_v50  ;;  %v1175_v29 = vpop.eup %807  ;;  %v250_v50 = vmul.f32 0.5, %v1008_v7  ;;  %v639_v7 = vld [vmem:[#allocation8 + $0x128] sm:$0xff]  ;;  %v378_v61 = vand.u32 2147483647, %v1126_v26  ;;  %v396_v62 = vmul.f32 %v395_v37, %v1063_v48  ;;  %683 = vmatpush.msrb.mxu0 %v604_v16 }
  0xdd   :  { %v333_v18 = vadd.f32 %v1121_v22, %v332_v58  ;;  %v370_v41 = vmul.f32 %v1175_v29, %v1126_v26  ;;  %809 = vrcp.f32 %v1199_v46  ;;  %v620_v58 = vld [vmem:[#allocation8 + $0x90] sm:$0xff]  ;;  %vm375_vm8 = vweird.f32 %v1175_v29  ;;  %725 = vmatpush.msrb.mxu2 %v640_v49 }
  0xde   :  { %v297_v30 = vsel %vm1153_vm3, %v1116_v17, %v293_v1  ;;  %v603_v1 = vld [vmem:[#allocation8 + $0x8] sm:$0xff]  ;;  %v251_v3 = vmul.f32 0.5, %v1012_v8  ;;  %vm374_vm9 = vweird.f32 %v1126_v26  ;;  %v430_v48 = vmul.f32 %v429_v10, %v1114_v13  ;;  %v654_v8 = vld [vmem:[#allocation8 + $0x1a0] sm:$0xff] }
  0xdf   :  { %v302_v40 = vsel %vm1161_vm5, %v301_v38, %v297_v30  ;;  %v337_v17 = vsel %vm1184_vm7, %v1121_v22, %v333_v18  ;;  %v621_v22 = vld [vmem:[#allocation8 + $0x98] sm:$0xff]  ;;  %v371_v51 = vsub.f32 1.0, %v370_v41  ;;  %v546_v38 = vmul.f32 %v1202_v47, %v1202_v47  ;;  %726 = vmatpush.msrb.mxu2 %v639_v7  ;;  %vm1226_vm10 = vmor %vm374_vm9, %vm375_vm8  ;;  %684 = vmatpush.msrb.mxu0 %v603_v1  ;;  %v618_v30 = vld [vmem:[#allocation8 + $0x80] sm:$0xff] }
  0xe0   :  { %v303_v44 = vmul.f32 %v302_v40, %v1110_v5  ;;  %v342_v45 = vsel %vm1165_vm6, %v341_v34, %v337_v17  ;;  %v656_v5 = vld [vmem:[#allocation8 + $0x1b0] sm:$0xff]  ;;  %705 = vmatpush.msrb.mxu1 %v621_v22  ;;  %v469_v18 = vadd.f32 0.00028619796, %v468_v52  ;;  %v508_v9 = vmul.f32 2.1237322e-06, %v1206_v53  ;;  %v653_v40 = vld [vmem:[#allocation8 + $0x198] sm:$0xff] }
  0xe1   :  { %v343_v54 = vmul.f32 %v342_v45, %v1132_v32  ;;  %v372_v59 = vmul.f32 %v1175_v29, %v371_v51  ;;  %v655_v32 = vld [vmem:[#allocation8 + $0x1a8] sm:$0xff]  ;;  %748 = vmatpush.msrb.mxu3 %v656_v5  ;;  %v381_v24 = vor.u32 1.1754944e-38, %v380_v57  ;;  %v1230_v28 = vmin.f32 %v546_v38, 16.0  ;;  %727 = vmatpush.msrb.mxu2 %v638_v6  ;;  %v652_v22 = vld [vmem:[#allocation8 + $0x190] sm:$0xff] }
  0xe2   :  { %v785_v14 = vclamps-f32 %v303_v44, 1.0  ;;  %706 = vmatpush.msrb.mxu1 %v620_v58  ;;  %v358_v37 = vmul.f32 %v357_v56, %v1043_v25  ;;  %vm379_vm11 = vcmp.eq.f32.partialorder %v378_v61, 8.507059e+37  ;;  %v397_v26 = vadd.f32 1.1283791, %v396_v62  ;;  %685 = vmatpush.msrb.mxu0 %v602_v2 }
  0xe3   :  { %v373_v11 = vadd.f32 %v1175_v29, %v372_v59  ;;  %749 = vmatpush.msrb.mxu3 %v655_v32  ;;  %v786_v35 = vclamps-f32 %v343_v54, 1.0  ;;  %v1236_v17 = vpop.eup %809  ;;  %v548_v10 = vmul.f32 2.1237322e-06, %v1230_v28  ;;  %v252_v25 = vmul.f32 0.5, %v1032_v19  ;;  %728 = vmatpush.msrb.mxu2 %v637_v33  ;;  %v651_v19 = vld [vmem:[#allocation8 + $0x188] sm:$0xff]  ;;  %v634_v59 = vld [vmem:[#allocation8 + $0x100] sm:$0xff] }
  0xe4   :  { %v586_v34 = vadd.f32 1.0, %v785_v14  ;;  %707 = vmatpush.msrb.mxu1 %v619_v4  ;;  %v431_v45 = vadd.f32 0.0036580483, %v430_v48  ;;  %v470_v49 = vmul.f32 %v469_v18, %v1171_v21  ;;  %v509_v51 = vadd.f32 0.00028619796, %v508_v9 }
  0xe5   :  { %v377_v39 = vsel %vm1226_vm10, %v1175_v29, %v373_v11  ;;  %750 = vmatpush.msrb.mxu3 %v654_v8  ;;  %v587_v43 = vadd.f32 1.0, %v786_v35  ;;  %v410_v29 = vmul.f32 %v1236_v17, %v1199_v46  ;;  %v549_v52 = vadd.f32 0.00028619796, %v548_v10  ;;  %729 = vmatpush.msrb.mxu2 %v636_v36 }
  0xe6   :  { %v382_v41 = vsel %vm379_vm11, %v381_v24, %v377_v39  ;;  %v594_v42 = vmul.f32 %v586_v34, %v250_v50  ;;  %708 = vmatpush.msrb.mxu1 %v618_v30  ;;  %v635_v50 = vld [vmem:[#allocation8 + $0x108] sm:$0xff]  ;;  %v398_v54 = vmul.f32 %v397_v26, %v1048_v31  ;;  %v439_v16 = vmul.f32 3.8918573e-05, %v1114_v13  ;;  %v650_v31 = vld [vmem:[#allocation8 + $0x180] sm:$0xff] }
  0xe7   :  { %v383_v44 = vmul.f32 %v382_v41, %v358_v37  ;;  %751 = vmatpush.msrb.mxu3 %v653_v40  ;;  %v595_v5 = vmul.f32 %v587_v43, %v251_v3  ;;  %v411_v56 = vsub.f32 1.0, %v410_v29  ;;  %vm414_vm12 = vweird.f32 %v1199_v46  ;;  %730 = vmatpush.msrb.mxu2 %v635_v50 }
  0xe8   :  { %686 = vmatmul.f32.vlgmr.msrb.gmra.mxu0 %v594_v42  ;;  %v418_v58 = vand.u32 2147483647, %v1199_v46  ;;  %v420_v7 = vand.u32 2147483648, %v1199_v46  ;;  %v479_v61 = vmul.f32 3.8918573e-05, %v1171_v21  ;;  %vm415_vm13 = vweird.f32 %v1236_v17 }
  0xe9   :  { %v787_v57 = vclamps-f32 %v383_v44, 1.0  ;;  %709 = vmatmul.f32.vlgmr.msrb.gmra.mxu1 %v595_v5  ;;  %752 = vmatpush.msrb.mxu3 %v652_v22  ;;  %v412_v62 = vmul.f32 %v1236_v17, %v411_v56  ;;  %v440_v1 = vadd.f32 0.001143296, %v439_v16  ;;  %v471_v3 = vadd.f32 0.0036580483, %v470_v49  ;;  %vm416_vm14 = vmor %vm414_vm12, %vm415_vm13 }
  0xea   :  { %v510_v38 = vmul.f32 %v509_v51, %v1206_v53  ;;  %v550_v4 = vmul.f32 %v549_v52, %v1230_v28  ;;  %v480_v6 = vadd.f32 0.001143296, %v479_v61  ;;  %731 = vmatpush.msrb.mxu2 %v634_v59  ;;  %v519_v18 = vmul.f32 3.8918573e-05, %v1206_v53 }
  0xeb   :  { %v588_v32 = vadd.f32 1.0, %v787_v57  ;;  %753 = vmatpush.msrb.mxu3 %v651_v19  ;;  %v413_v14 = vadd.f32 %v1236_v17, %v412_v62  ;;  %v441_v48 = vmul.f32 %v440_v1, %v1114_v13  ;;  %vm419_vm15 = vcmp.eq.f32.partialorder %v418_v58, 8.507059e+37 }
  0xec   :  { %v421_v9 = vor.u32 1.1754944e-38, %v420_v7  ;;  %v432_v8 = vmul.f32 %v431_v45, %v1114_v13  ;;  %v481_v2 = vmul.f32 %v480_v6, %v1171_v21  ;;  %v520_v30 = vadd.f32 0.001143296, %v519_v18 }
  0xed   :  { %v596_v11 = vmul.f32 %v588_v32, %v252_v25  ;;  %754 = vmatpush.msrb.mxu3 %v650_v31  ;;  %v417_v12 = vsel %vm416_vm14, %v1236_v17, %v413_v14  ;;  %v442_v24 = vadd.f32 0.014752088, %v441_v48  ;;  %v559_v33 = vmul.f32 3.8918573e-05, %v1230_v28 }
  0xee   :  { %v422_v34 = vsel %vm419_vm15, %v421_v9, %v417_v12  ;;  %v472_v35 = vmul.f32 %v471_v3, %v1171_v21  ;;  %v511_v37 = vadd.f32 0.0036580483, %v510_v38  ;;  %v551_v46 = vadd.f32 0.0036580483, %v550_v4 }
  0xef   :  { %732 = vmatmul.f32.vlgmr.msrb.gmra.mxu2 %v596_v11  ;;  %v423_v39 = vmul.f32 %v422_v34, %v398_v54  ;;  %v443_v26 = vmul.f32 %v442_v24, %v1114_v13  ;;  %v482_v40 = vadd.f32 0.014752088, %v481_v2  ;;  %v521_v41 = vmul.f32 %v520_v30, %v1206_v53 }
  0xf0   :  { %v253_v10 = vmul.f32 0.5, %v1036_v20  ;;  %v433_v42 = vadd.f32 0.05243302, %v432_v8  ;;  %v560_v17 = vadd.f32 0.001143296, %v559_v33  ;;  %v512_v45 = vmul.f32 %v511_v37, %v1206_v53 }
  0xf1   :  { %v788_v43 = vclamps-f32 %v423_v39, 1.0  ;;  %v444_v36 = vadd.f32 0.112945676, %v443_v26  ;;  %v483_v25 = vmul.f32 %v482_v40, %v1171_v21  ;;  %v522_v44 = vadd.f32 0.014752088, %v521_v41 }
  0xf2   :  { %v473_v29 = vadd.f32 0.05243302, %v472_v35  ;;  %v552_v22 = vmul.f32 %v551_v46, %v1230_v28  ;;  %v561_v49 = vmul.f32 %v560_v17, %v1230_v28  ;;  %v434_v50 = vmul.f32 %v433_v42, %v1114_v13 }
  0xf3   :  { %v589_v51 = vadd.f32 1.0, %v788_v43  ;;  %v445_v52 = vmul.f32 %v444_v36, %v1114_v13  ;;  %v484_v5 = vadd.f32 0.112945676, %v483_v25  ;;  %v523_v20 = vmul.f32 %v522_v44, %v1206_v53 }
  0xf4   :  { %v562_v54 = vadd.f32 0.014752088, %v561_v49  ;;  %v474_v58 = vmul.f32 %v473_v29, %v1171_v21  ;;  %v513_v7 = vadd.f32 0.05243302, %v512_v45  ;;  %v553_v61 = vadd.f32 0.05243302, %v552_v22 }
  0xf5   :  { %v597_v56 = vmul.f32 %v589_v51, %v253_v10  ;;  %v446_v19 = vadd.f32 0.4994258, %v445_v52  ;;  %v485_v57 = vmul.f32 %v484_v5, %v1171_v21  ;;  %v524_v16 = vadd.f32 0.112945676, %v523_v20 }
  0xf6   :  { %v563_v59 = vmul.f32 %v562_v54, %v1230_v28  ;;  %v435_v3 = vadd.f32 0.18741608, %v434_v50  ;;  %v475_v14 = vadd.f32 0.18741608, %v474_v58  ;;  %v514_v48 = vmul.f32 %v513_v7, %v1206_v53 }
  0xf7   :  { %755 = vmatmul.f32.vlgmr.msrb.gmra.mxu3 %v597_v56  ;;  %v447_v62 = vmul.f32 %v446_v19, %v1114_v13  ;;  %v486_v31 = vadd.f32 0.4994258, %v485_v57  ;;  %v525_v32 = vmul.f32 %v524_v16, %v1206_v53  ;;  %v554_v18 = vmul.f32 %v553_v61, %v1230_v28 }
  0xf8   :  { %v564_v1 = vadd.f32 0.112945676, %v563_v59  ;;  %v436_v12 = vmul.f32 %v435_v3, %v1114_v13  ;;  %v476_v24 = vmul.f32 %v475_v14, %v1171_v21  ;;  %v515_v30 = vadd.f32 0.18741608, %v514_v48 }
  0xf9   :  { %v448_v38 = vadd.f32 1.0, %v447_v62  ;;  %v487_v4 = vmul.f32 %v486_v31, %v1171_v21  ;;  %v526_v6 = vadd.f32 0.4994258, %v525_v32  ;;  %v555_v33 = vadd.f32 0.18741608, %v554_v18 }
  0xfa   :  { %v565_v11 = vmul.f32 %v564_v1, %v1230_v28  ;;  %v437_v46 = vadd.f32 1.1283791, %v436_v12  ;;  %v477_v39 = vadd.f32 1.1283791, %v476_v24  ;;  %v516_v41 = vmul.f32 %v515_v30, %v1206_v53 }
  0xfb   :  { %811 = vrcp.f32 %v448_v38  ;;  %v488_v9 = vadd.f32 1.0, %v487_v4  ;;  %v527_v8 = vmul.f32 %v526_v6, %v1206_v53  ;;  %v556_v13 = vmul.f32 %v555_v33, %v1230_v28 }
  0xfc   :  { %v566_v2 = vadd.f32 0.4994258, %v565_v11  ;;  %v458_v42 = vand.u32 2147483647, %v448_v38  ;;  %v254_v17 = vmul.f32 0.5, %v1066_v55  ;;  %v438_v43 = vmul.f32 %v437_v46, %v1079_v23 }
  0xfd   :  { %813 = vrcp.f32 %v488_v9  ;;  %v1287_v34 = vadd.f32 1.0, %v527_v8  ;;  %v460_v36 = vand.u32 2147483648, %v448_v38  ;;  %v478_v44 = vmul.f32 %v477_v39, %v1129_v27 }
  0xfe   :  { %v567_v35 = vmul.f32 %v566_v2, %v1230_v28  ;;  %v498_v45 = vand.u32 2147483647, %v488_v9  ;;  %v517_v53 = vadd.f32 1.1283791, %v516_v41  ;;  %v557_v49 = vadd.f32 1.1283791, %v556_v13 }
  0xff   :  { %815 = vrcp.f32 %v1287_v34  ;;  %v500_v51 = vand.u32 2147483648, %v488_v9  ;;  %vm454_vm1 = vweird.f32 %v448_v38  ;;  %vm459_vm2 = vcmp.eq.f32.partialorder %v458_v42, 8.507059e+37 }
 0x100   :  { %v1291_v40 = vadd.f32 1.0, %v567_v35  ;;  %v461_v55 = vor.u32 1.1754944e-38, %v460_v36  ;;  %v540_v20 = vand.u32 2147483648, %v1287_v34  ;;  %vm494_vm5 = vweird.f32 %v488_v9 }
 0x101   :  { %v812_v37 = vpop.eup %811  ;;  %vm1301_vm6 = vcmp.eq.f32.partialorder %v498_v45, 8.507059e+37  ;;  %v501_v16 = vor.u32 1.1754944e-38, %v500_v51  ;;  %v538_v61 = vand.u32 2147483647, %v1287_v34  ;;  %vm534_vm9 = vweird.f32 %v1287_v34 }
 0x102   :  { %v450_v26 = vmul.f32 %v812_v37, %v448_v38  ;;  %817 = vrcp.f32 %v1291_v40  ;;  %vm455_vm0 = vweird.f32 %v812_v37  ;;  %v541_v31 = vor.u32 1.1754944e-38, %v540_v20 }
 0x103   :  { %v814_v21 = vpop.eup %813  ;;  %vm456_vm3 = vmor %vm454_vm1, %vm455_vm0  ;;  %v580_v4 = vand.u32 2147483648, %v1291_v40  ;;  %v578_v11 = vand.u32 2147483647, %v1291_v40  ;;  %v518_v48 = vmul.f32 %v517_v53, %v1143_v15  ;;  %vm539_vm12 = vcmp.eq.f32.partialorder %v538_v61, 8.507059e+37 }
 0x104   :  { %v451_v10 = vsub.f32 1.0, %v450_v26  ;;  %v490_v25 = vmul.f32 %v814_v21, %v488_v9  ;;  %vm495_vm4 = vweird.f32 %v814_v21  ;;  %vm574_vm13 = vweird.f32 %v1291_v40 }
 0x105   :  { %v816_v22 = vpop.eup %815  ;;  %vm496_vm7 = vmor %vm494_vm5, %vm495_vm4  ;;  %v255_v24 = vmul.f32 0.5, %v1099_v60  ;;  %v558_v35 = vmul.f32 %v557_v49, %v1202_v47  ;;  %vm579_vm15 = vcmp.eq.f32.partialorder %v578_v11, 8.507059e+37  ;;  %v256_v13 = vmul.f32 0.5, %v1103_v63  ;;  %v802_v47 = vld [vmem:[%s1331_s4] ss:$0 sm:$0xff]  ;;  %s770_s4 = sshll.u32 %s1332_s5, 4  ;;  %s771_s4 = int_to_ptr.hbm [resolvable:$true] %s770_s4 }
 0x106   :  { %v452_v29 = vmul.f32 %v812_v37, %v451_v10  ;;  %v491_v28 = vsub.f32 1.0, %v490_v25  ;;  %v530_v5 = vmul.f32 %v816_v22, %v1287_v34  ;;  %vm535_vm8 = vweird.f32 %v816_v22 }
 0x107   :  { %vm536_vm10 = vmor %vm534_vm9, %vm535_vm8  ;;  %v581_v34 = vor.u32 1.1754944e-38, %v580_v4  ;;  %v257_v10 = vmul.f32 0.5, %v1107_v0 }
 0x108   :  { %v453_v52 = vadd.f32 %v812_v37, %v452_v29  ;;  %v492_v23 = vmul.f32 %v814_v21, %v491_v28  ;;  %v818_v27 = vpop.eup %817  ;;  %v531_v56 = vsub.f32 1.0, %v530_v5 }
 0x109   :  { %v570_v58 = vmul.f32 %v818_v27, %v1291_v40  ;;  %vm575_vm11 = vweird.f32 %v818_v27 }
 0x10a   :  { %v457_v50 = vsel %vm456_vm3, %v812_v37, %v453_v52  ;;  %v493_v57 = vadd.f32 %v814_v21, %v492_v23  ;;  %v532_v59 = vmul.f32 %v816_v22, %v531_v56  ;;  %vm576_vm14 = vmor %vm574_vm13, %vm575_vm11 }
 0x10b   :  { %v462_v19 = vsel %vm459_vm2, %v461_v55, %v457_v50  ;;  %v571_v32 = vsub.f32 1.0, %v570_v58 }
 0x10c   :  { %v463_v7 = vmul.f32 %v462_v19, %v438_v43  ;;  %v497_v62 = vsel %vm496_vm7, %v814_v21, %v493_v57  ;;  %v533_v38 = vadd.f32 %v816_v22, %v532_v59 }
 0x10d   :  { %v502_v3 = vsel %vm1301_vm6, %v501_v16, %v497_v62  ;;  %v572_v14 = vmul.f32 %v818_v27, %v571_v32 }
 0x10e   :  { %v789_v1 = vclamps-f32 %v463_v7, 1.0  ;;  %v503_v6 = vmul.f32 %v502_v3, %v478_v44  ;;  %v537_v9 = vsel %vm536_vm10, %v816_v22, %v533_v38 }
 0x10f   :  { %v542_v2 = vsel %vm539_vm12, %v541_v31, %v537_v9  ;;  %v573_v12 = vadd.f32 %v818_v27, %v572_v14 }
 0x110   :  { %v590_v18 = vadd.f32 1.0, %v789_v1  ;;  %v790_v8 = vclamps-f32 %v503_v6, 1.0  ;;  %v543_v33 = vmul.f32 %v542_v2, %v518_v48 }
 0x111   :  { %v577_v46 = vsel %vm576_vm14, %v818_v27, %v573_v12 }
 0x112   :  { %v598_v30 = vmul.f32 %v590_v18, %v254_v17  ;;  %v591_v37 = vadd.f32 1.0, %v790_v8  ;;  %v791_v15 = vclamps-f32 %v543_v33, 1.0  ;;  %v582_v39 = vsel %vm579_vm15, %v581_v34, %v577_v46 }
 0x113   :  { %v583_v41 = vmul.f32 %v582_v39, %v558_v35 }
 0x114   :  { %689 = vmatmul.f32.gmra.mxu0 %v598_v30  ;;  %v599_v26 = vmul.f32 %v591_v37, %v255_v24  ;;  %v592_v21 = vadd.f32 1.0, %v791_v15 }
 0x115   :  { %v792_v40 = vclamps-f32 %v583_v41, 1.0 }
 0x116   :  { %712 = vmatmul.f32.gmra.mxu1 %v599_v26  ;;  %v600_v60 = vmul.f32 %v592_v21, %v256_v13 }
 0x117   :  { %v593_v42 = vadd.f32 1.0, %v792_v40 }
 0x118   :  { %735 = vmatmul.f32.gmra.mxu2 %v600_v60 }
 0x119   :  { %v601_v17 = vmul.f32 %v593_v42, %v257_v10 }
 0x11b   :  { %758 = vmatmul.f32.gmra.mxu3 %v601_v17 }
 0x165   :  { %v687_v43 = vpop.f32.mrf.mxu0 }
 0x166   :  { %v688_v36 = vadd.f32 %v802_v47, %v687_v43  ;;  %v710_v25 = vpop.f32.mrf.mxu1 }
 0x168   :  { %v711_v44 = vadd.f32 %v710_v25, %v688_v36 }
 0x172   :  { %v733_v29 = vpop.f32.mrf.mxu2 }
 0x173   :  { %v734_v63 = vadd.f32 %v733_v29, %v711_v44 }
 0x17a   :  { %v756_v45 = vpop.f32.mrf.mxu3 }
 0x17b   :  { %v757_v22 = vadd.f32 %v756_v45, %v734_v63 }
 0x17d   :  { %762 = vst [vmem:[#allocation10] sm:$0xff] %v757_v22 }
 0x191   :  { %v690_v53 = vpop.f32.mrf.mxu0 }
 0x192   :  { %v691_v49 = vadd.f32 %v802_v47, %v690_v53 }
 0x193   :  { %v713_v0 = vpop.f32.mrf.mxu1 }
 0x194   :  { %v714_v28 = vadd.f32 %v713_v0, %v691_v49 }
 0x19b   :  { %v736_v51 = vpop.f32.mrf.mxu2 }
 0x19c   :  { %v737_v52 = vadd.f32 %v736_v51, %v714_v28 }
 0x19e   :  { %v759_v5 = vpop.f32.mrf.mxu3 }
 0x19f   :  { %v760_v55 = vadd.f32 %v759_v5, %v737_v52 }
 0x1a1   :  { %763 = vst [vmem:[#allocation10 + $0x8] sm:$0xff] %v760_v55 }
 0x1a2   :  { %776 = dma.vmem_to_hbm [thread:$0]  %s769_s16, 256, %s771_s4, [#allocation4], %s951_s30, %s951_s30, %s952_s6  }
 0x1a3   :  { %945 = dma.done.wait [#allocation4], 256  }
 0x1a4   :  { %946 = vsyncadd [#allocation4], 4294967040 }
 0x1a5   :  { %781 = vsyncpa [#allocation3], 1 }
 0x1a6   :  { %782 = vsyncpa [#allocation6], 1 }
 0x1a7   :  { %783 = vsyncpa [#allocation9], 1 }
 0x1a8   :  { %784 = vsyncpa [#allocation4], 1 }

</bundles_post_ra>
